<compile_context>
chip_gen: v7x
topology: tpu7x:2x2x1
jax: 0.10.0
libtpu: 0.0.40
codegen_flags: <defaults>
</compile_context>

<pallas_src>
import inspect
import math

import jax
import jax.numpy as jnp
from jax import lax
from jax.experimental import pallas as pl
from jax.experimental.pallas import tpu as pltpu


# ----------------------------------------------------------------------------- kernel
def make_adapter_kernel(eps: float, h_true: int, h_pad: int):
    inv_h = 1.0 / float(h_true)

    def adapter_kernel(x_ref, wd_ref, bd_ref, wu_ref, bu_ref, g_ref, b_ref, o_ref):
        x = x_ref[...]                                            # (TM, Hp) native dtype

        # down_project on the MXU: (TM, Hp) @ (Hp, Pp), f32 accumulate
        h = jnp.dot(x, wd_ref[...], preferred_element_type=jnp.float32)
        h = h + bd_ref[...].astype(jnp.float32)

        # activation (EUP slot)
        a = jnp.tanh(h)

        # up_project: (TM, Pp) @ (Pp, Hp); feed the MXU in the weights' dtype
        u = jnp.dot(a.astype(wu_ref.dtype), wu_ref[...],
                    preferred_element_type=jnp.float32)
        u = u + bu_ref[...].astype(jnp.float32)

        # dropout is identity in eval/inference mode
        # TODO(synk): training-mode dropout (pltpu.prng_random_bits mask) not emitted.

        # residual + LayerNorm over the TRUE hidden size.  Padded lanes of x and u are
        # exactly zero (zero-padded inputs / weights / biases), so plain sums over the
        # padded lane axis equal sums over the true H.
        r = x.astype(jnp.float32) + u                              # (TM, Hp) f32
        mean = jnp.sum(r, axis=-1, keepdims=True) * inv_h
        cen = r - mean
        if h_pad != h_true:
            lane = lax.broadcasted_iota(jnp.int32, r.shape, dimension=r.ndim - 1)
            cen = jnp.where(lane < h_true, cen, 0.0)               # exclude pad lanes
        var = jnp.sum(cen * cen, axis=-1, keepdims=True) * inv_h
        y = cen * lax.rsqrt(var + eps)
        y = y * g_ref[...].astype(jnp.float32) + b_ref[...].astype(jnp.float32)

        o_ref[...] = y.astype(o_ref.dtype)

    return adapter_kernel


# -------------------------------------------------------------------------- utilities
def _round_up(n: int, m: int) -> int:
    return ((n + m - 1) // m) * m


def _sublane_pack(itemsize: int) -> int:
    # 8 sublanes of 32-bit; sub-32-bit dtypes pack along sublanes.
    return max(8, 32 // max(1, itemsize))


def _vmem_estimate(tm, Hp, Pp, x_isz, w_isz, single_buffer_consts):
    io = 2 * (2 * tm * Hp * x_isz)                    # x + out tiles, double-buffered
    interm = 5 * tm * Hp * 4 + 2 * tm * Pp * 4        # f32 r/cen/y/x_f32/u + h/a
    nbuf = 1 if single_buffer_consts else 2
    consts = nbuf * ((Hp * Pp + Pp * Hp) * w_isz + (Pp + 3 * Hp) * 4)
    return io + interm + consts


def _tpu_vmem_capacity_bytes() -> int:
    cap = None
    try:
        info = pltpu.get_tpu_info()
        cap = getattr(info, "vmem_capacity_bytes", None)
    except Exception:
        # Hardware-query only; never guards the executed configuration.
        cap = None
    return int(cap) if cap else (64 << 20)            # conservative default (v7x-like)


def _generation_budget(cap_bytes: int):
    if cap_bytes >= (100 << 20):                      # v5e / v6e: 128 MiB physical
        return 96 << 20, 110 << 20, 1                 # budget, limit cap, min grid steps
    # v7x: 64 MiB per TensorCore, 2 TCs per chip -> want >= 2 grid steps
    return 40 << 20, 52 << 20, 2


def _choose_tile_m(M, Hp, Pp, x_isz, w_isz, requested, budget, sublane,
                   min_grid_steps, single_buffer_consts):
    tm = max(sublane, min(_round_up(requested, sublane), _round_up(M, sublane)))
    while tm > sublane and _vmem_estimate(tm, Hp, Pp, x_isz, w_isz,
                                          single_buffer_consts) > budget:
        tm = max(sublane, _round_up(tm // 2, sublane))
    # Ensure the "parallel" row axis has enough steps to shard across TensorCores.
    while tm > sublane and pl.cdiv(M, tm) < min_grid_steps:
        tm = max(sublane, _round_up(tm // 2, sublane))
    return tm


def _supports_pipeline_mode() -> bool:
    if not hasattr(pl, "Buffered"):
        return False
    try:
        params = inspect.signature(pl.BlockSpec).parameters
    except (TypeError, ValueError):
        return False
    return "pipeline_mode" in params


# ------------------------------------------------------------------------ call builder
def _build_adapter_call(M_pad, Hp, Pp, H_true, tile_m, out_dtype, eps,
                        vmem_limit_bytes, single_buffer_consts):
    kernel = make_adapter_kernel(eps, H_true, Hp)

    def const_spec(shape):
        idx = lambda i: (0, 0)
        if single_buffer_consts:
            # Constant index_map -> same block every step; one buffer is enough and
            # the reclaimed VMEM goes back to the row tiles.
            return pl.BlockSpec(shape, idx, pipeline_mode=pl.Buffered(1))
        return pl.BlockSpec(shape, idx)

    return pl.pallas_call(
        kernel,
        out_shape=jax.ShapeDtypeStruct((M_pad, Hp), out_dtype),
        grid_spec=pltpu.PrefetchScalarGridSpec(
            num_scalar_prefetch=0,
            grid=(M_pad // tile_m,),
            in_specs=[
                pl.BlockSpec((tile_m, Hp), lambda i: (i, 0)),   # x row tile
                const_spec((Hp, Pp)),                           # W_down (full)
                const_spec((1, Pp)),                            # b_down
                const_spec((Pp, Hp)),                           # W_up (full)
                const_spec((1, Hp)),                            # b_up
                const_spec((1, Hp)),                            # LN gamma
                const_spec((1, Hp)),                            # LN beta
            ],
            out_specs=pl.BlockSpec((tile_m, Hp), lambda i: (i, 0)),
        ),
        compiler_params=pltpu.CompilerParams(
            dimension_semantics=("parallel",),
            vmem_limit_bytes=vmem_limit_bytes,
        ),
    )


# ----------------------------------------------------------------------------- wrapper
def adapter_forward(hidden_states, w_down, b_down, w_up, b_up, gamma, beta, *,
                    eps=1e-12, tile_m=512):
    """hidden_states: (..., H).  w_down: (H, P), w_up: (P, H) (pre-transposed,
    i.e. torch weight.T).  Biases/gamma/beta: (1, P) / (1, H)."""
    orig_shape = hidden_states.shape
    H = orig_shape[-1]
    P = w_down.shape[1]
    x = hidden_states.reshape(-1, H)
    M = x.shape[0]
    dtype = x.dtype

    # Lane-dense padding of the feature axes (biggest measured lever for odd H).
    Hp = _round_up(H, 128)
    Pp = _round_up(P, 128)

    # Explicit compute dtype for the MXU operands (no silent promotion).
    wd = jnp.pad(w_down.astype(dtype), ((0, Hp - H), (0, Pp - P)))
    wu = jnp.pad(w_up.astype(dtype), ((0, Pp - P), (0, Hp - H)))
    bd = jnp.pad(b_down, ((0, 0), (0, Pp - P)))
    bu = jnp.pad(b_up, ((0, 0), (0, Hp - H)))
    g = jnp.pad(gamma, ((0, 0), (0, Hp - H)))
    b = jnp.pad(beta, ((0, 0), (0, Hp - H)))

    x_isz = jnp.dtype(dtype).itemsize
    w_isz = jnp.dtype(wd.dtype).itemsize
    sublane = _sublane_pack(x_isz)

    cap = _tpu_vmem_capacity_bytes()
    budget, limit_cap, min_grid_steps = _generation_budget(cap)

    use_sb = _supports_pipeline_mode()
    tm = _choose_tile_m(M, Hp, Pp, x_isz, w_isz, tile_m, budget, sublane,
                        min_grid_steps, use_sb)
    est = _vmem_estimate(tm, Hp, Pp, x_isz, w_isz, use_sb)
    vmem_limit = int(min(limit_cap, max(16 << 20, est + (6 << 20))))

    # Pad rows so the grid covers M exactly; pad H lanes with zeros (kept out of LN).
    M_pad = _round_up(M, tm)
    xp = jnp.pad(x, ((0, M_pad - M), (0, Hp - H)))

    args = (xp, wd, bd, wu, bu, g, b)

    def build(single_buffer_consts):
        return _build_adapter_call(M_pad, Hp, Pp, H, tm, dtype, eps, vmem_limit,
                                   single_buffer_consts)

    if use_sb:
        # Trace-time lowering probe ONLY (feature check for pl.Buffered(1) on const
        # blocks).  The executed configuration below is never wrapped in try/except,
        # so genuine compile/VMEM errors surface loudly instead of being masked.
        try:
            avals = [jax.ShapeDtypeStruct(a.shape, a.dtype) for a in args]
            jax.jit(build(True)).lower(*avals)
        except Exception:
            use_sb = False

    out = build(use_sb)(*args)

    out = out[:M, :H]
    return out.reshape(orig_shape)


# --------------------------------------------------------------------------- reference
def reference_forward(x, w_down, b_down, w_up, b_up, gamma, beta, eps=1e-12):
    h = jnp.tanh(x @ w_down + b_down)
    u = h @ w_up + b_up
    r = x + u
    mean = jnp.mean(r, axis=-1, keepdims=True)
    var = jnp.mean((r - mean) ** 2, axis=-1, keepdims=True)
    return (r - mean) / jnp.sqrt(var + eps) * gamma + beta


# -------------------------------------------------------------------------------- main
if __name__ == "__main__":
    # Config (small, consistent with the module): hidden_size=32, project_dim=16
    batch, seq, hidden, proj = 2, 8, 32, 16
    eps = 1e-12

    key = jax.random.PRNGKey(0)
    kx, kwd, kbd, kwu, kbu = jax.random.split(key, 5)

    # Inputs: (batch, seq, hidden)
    x3 = jax.random.normal(kx, (batch, seq, hidden), dtype=jnp.float32)

    # Deterministic parameter init (nn.Linear-style, identity_init=False path).
    # PyTorch Linear stores weight as (out, in); we pre-transpose to (in, out).
    bound_d = 1.0 / math.sqrt(hidden)
    w_down = jax.random.uniform(kwd, (hidden, proj), minval=-bound_d, maxval=bound_d,
                                dtype=jnp.float32)
    b_down = jax.random.uniform(kbd, (1, proj), minval=-bound_d, maxval=bound_d,
                                dtype=jnp.float32)
    bound_u = 1.0 / math.sqrt(proj)
    w_up = jax.random.uniform(kwu, (proj, hidden), minval=-bound_u, maxval=bound_u,
                              dtype=jnp.float32)
    b_up = jax.random.uniform(kbu, (1, hidden), minval=-bound_u, maxval=bound_u,
                              dtype=jnp.float32)

    # LayerNorm (elementwise_affine=True): gamma=1, beta=0
    gamma = jnp.ones((1, hidden), dtype=jnp.float32)
    beta = jnp.zeros((1, hidden), dtype=jnp.float32)

    out3 = adapter_forward(x3, w_down, b_down, w_up, b_up, gamma, beta, eps=eps)
    out3 = jax.block_until_ready(out3)

    x2 = x3.reshape(batch * seq, hidden)
    ref = reference_forward(x2, w_down, b_down, w_up, b_up, gamma, beta, eps=eps)
    ref3 = ref.reshape(batch, seq, hidden)

    assert out3.shape == (batch, seq, hidden)
    assert jnp.all(jnp.isfinite(out3)), "non-finite output"
    assert jnp.allclose(out3, ref3, atol=1e-5, rtol=1e-5), "mismatch vs reference"

    print("KERNEL_OK")
</pallas_src>

<mosaic_0001>
module attributes {stable_mosaic.version = 11 : i64} {
  func.func @adapter_kernel(%arg0: i32, %arg1: memref<8x128xf32, #tpu.memory_space<vmem>>, %arg2: memref<128x128xf32, #tpu.memory_space<vmem>>, %arg3: memref<1x128xf32, #tpu.memory_space<vmem>>, %arg4: memref<128x128xf32, #tpu.memory_space<vmem>>, %arg5: memref<1x128xf32, #tpu.memory_space<vmem>>, %arg6: memref<1x128xf32, #tpu.memory_space<vmem>>, %arg7: memref<1x128xf32, #tpu.memory_space<vmem>>, %arg8: memref<8x128xf32, #tpu.memory_space<vmem>>) attributes {dimension_semantics = [#tpu.dimension_semantics<parallel>], iteration_bounds = array<i64: 2>, scalar_prefetch = 0 : i64, scratch_operands = 0 : i64, tpu.core_type = #tpu.core_type<tc>, window_params = [{transform_indices = @transform_0, window_bounds = array<i64: 8, 128>}, {pipeline_mode = #tpu.pipeline_mode<synchronous>, transform_indices = @transform_1, window_bounds = array<i64: 128, 128>}, {pipeline_mode = #tpu.pipeline_mode<synchronous>, transform_indices = @transform_2, window_bounds = array<i64: 1, 128>}, {pipeline_mode = #tpu.pipeline_mode<synchronous>, transform_indices = @transform_3, window_bounds = array<i64: 128, 128>}, {pipeline_mode = #tpu.pipeline_mode<synchronous>, transform_indices = @transform_4, window_bounds = array<i64: 1, 128>}, {pipeline_mode = #tpu.pipeline_mode<synchronous>, transform_indices = @transform_5, window_bounds = array<i64: 1, 128>}, {pipeline_mode = #tpu.pipeline_mode<synchronous>, transform_indices = @transform_6, window_bounds = array<i64: 1, 128>}, {transform_indices = @transform_7, window_bounds = array<i64: 8, 128>}]} {
    %c0 = arith.constant 0 : index
    %c0_0 = arith.constant 0 : index
    %0 = vector.load %arg1[%c0, %c0_0] : memref<8x128xf32, #tpu.memory_space<vmem>>, vector<8x128xf32>
    %c0_1 = arith.constant 0 : index
    %c0_2 = arith.constant 0 : index
    %1 = vector.load %arg2[%c0_1, %c0_2] : memref<128x128xf32, #tpu.memory_space<vmem>>, vector<128x128xf32>
    %cst = arith.constant dense<0.000000e+00> : vector<8x128xf32>
    %2 = tpu.matmul %0, %1, %cst {dimension_numbers = #tpu.dot_dimension_numbers<[1], [0], [0], [1], [0, 0, 1, 1], [], []>} : vector<8x128xf32>, vector<128x128xf32>, vector<8x128xf32> -> vector<8x128xf32>
    %c0_3 = arith.constant 0 : index
    %c0_4 = arith.constant 0 : index
    %3 = vector.load %arg3[%c0_3, %c0_4] : memref<1x128xf32, #tpu.memory_space<vmem>>, vector<1x128xf32>
    %4 = vector.broadcast %3 : vector<1x128xf32> to vector<8x128xf32>
    %5 = arith.addf %2, %4 : vector<8x128xf32>
    %6 = math.tanh %5 : vector<8x128xf32>
    %c0_5 = arith.constant 0 : index
    %c0_6 = arith.constant 0 : index
    %7 = vector.load %arg4[%c0_5, %c0_6] : memref<128x128xf32, #tpu.memory_space<vmem>>, vector<128x128xf32>
    %cst_7 = arith.constant dense<0.000000e+00> : vector<8x128xf32>
    %8 = tpu.matmul %6, %7, %cst_7 {dimension_numbers = #tpu.dot_dimension_numbers<[1], [0], [0], [1], [0, 0, 1, 1], [], []>} : vector<8x128xf32>, vector<128x128xf32>, vector<8x128xf32> -> vector<8x128xf32>
    %c0_8 = arith.constant 0 : index
    %c0_9 = arith.constant 0 : index
    %9 = vector.load %arg5[%c0_8, %c0_9] : memref<1x128xf32, #tpu.memory_space<vmem>>, vector<1x128xf32>
    %10 = vector.broadcast %9 : vector<1x128xf32> to vector<8x128xf32>
    %11 = arith.addf %8, %10 : vector<8x128xf32>
    %12 = arith.addf %0, %11 : vector<8x128xf32>
    %cst_10 = arith.constant dense<0.000000e+00> : vector<8xf32>
    %13 = vector.multi_reduction <add>, %12, %cst_10 [1] : vector<8x128xf32> to vector<8xf32>
    %14 = vector.shape_cast %13 : vector<8xf32> to vector<8x1xf32>
    %cst_11 = arith.constant 3.125000e-02 : f32
    %15 = vector.broadcast %cst_11 : f32 to vector<8x1xf32>
    %16 = arith.mulf %14, %15 : vector<8x1xf32>
    %17 = vector.broadcast %16 : vector<8x1xf32> to vector<8x128xf32>
    %18 = arith.subf %12, %17 : vector<8x128xf32>
    %19 = tpu.iota {dimensions = array<i32: 1>} : vector<8x128xi32>
    %c32_i32 = arith.constant 32 : i32
    %20 = vector.broadcast %c32_i32 : i32 to vector<8x128xi32>
    %21 = arith.cmpi slt, %19, %20 : vector<8x128xi32>
    %cst_12 = arith.constant 0.000000e+00 : f32
    %22 = vector.broadcast %cst_12 : f32 to vector<8x128xf32>
    %23 = arith.select %21, %18, %22 : vector<8x128xi1>, vector<8x128xf32>
    %24 = arith.mulf %23, %23 : vector<8x128xf32>
    %cst_13 = arith.constant dense<0.000000e+00> : vector<8xf32>
    %25 = vector.multi_reduction <add>, %24, %cst_13 [1] : vector<8x128xf32> to vector<8xf32>
    %26 = vector.shape_cast %25 : vector<8xf32> to vector<8x1xf32>
    %cst_14 = arith.constant 3.125000e-02 : f32
    %27 = vector.broadcast %cst_14 : f32 to vector<8x1xf32>
    %28 = arith.mulf %26, %27 : vector<8x1xf32>
    %cst_15 = arith.constant 9.99999996E-13 : f32
    %29 = vector.broadcast %cst_15 : f32 to vector<8x1xf32>
    %30 = arith.addf %28, %29 : vector<8x1xf32>
    %31 = math.rsqrt %30 : vector<8x1xf32>
    %32 = vector.broadcast %31 : vector<8x1xf32> to vector<8x128xf32>
    %33 = arith.mulf %23, %32 : vector<8x128xf32>
    %c0_16 = arith.constant 0 : index
    %c0_17 = arith.constant 0 : index
    %34 = vector.load %arg6[%c0_16, %c0_17] : memref<1x128xf32, #tpu.memory_space<vmem>>, vector<1x128xf32>
    %35 = vector.broadcast %34 : vector<1x128xf32> to vector<8x128xf32>
    %36 = arith.mulf %33, %35 : vector<8x128xf32>
    %c0_18 = arith.constant 0 : index
    %c0_19 = arith.constant 0 : index
    %37 = vector.load %arg7[%c0_18, %c0_19] : memref<1x128xf32, #tpu.memory_space<vmem>>, vector<1x128xf32>
    %38 = vector.broadcast %37 : vector<1x128xf32> to vector<8x128xf32>
    %39 = arith.addf %36, %38 : vector<8x128xf32>
    %c0_20 = arith.constant 0 : index
    %c0_21 = arith.constant 0 : index
    %40 = vector.load %arg8[%c0_20, %c0_21] : memref<8x128xf32, #tpu.memory_space<vmem>>, vector<8x128xf32>
    tpu.vector_store %arg8[%c0_20, %c0_21], %39 {strides = array<i32>} : memref<8x128xf32, #tpu.memory_space<vmem>>, vector<8x128xf32>,
    return
  }
  func.func @transform_0(%arg0: i32) -> (i32, i32) {
    %c0_i32 = arith.constant 0 : i32
    %c0_i32_0 = arith.constant 0 : i32
    return %arg0, %c0_i32 : i32, i32
  }
  func.func @transform_1(%arg0: i32) -> (i32, i32) {
    %c0_i32 = arith.constant 0 : i32
    %c0_i32_0 = arith.constant 0 : i32
    %c0_i32_1 = arith.constant 0 : i32
    return %c0_i32, %c0_i32_0 : i32, i32
  }
  func.func @transform_2(%arg0: i32) -> (i32, i32) {
    %c0_i32 = arith.constant 0 : i32
    %c0_i32_0 = arith.constant 0 : i32
    %c0_i32_1 = arith.constant 0 : i32
    return %c0_i32, %c0_i32_0 : i32, i32
  }
  func.func @transform_3(%arg0: i32) -> (i32, i32) {
    %c0_i32 = arith.constant 0 : i32
    %c0_i32_0 = arith.constant 0 : i32
    %c0_i32_1 = arith.constant 0 : i32
    return %c0_i32, %c0_i32_0 : i32, i32
  }
  func.func @transform_4(%arg0: i32) -> (i32, i32) {
    %c0_i32 = arith.constant 0 : i32
    %c0_i32_0 = arith.constant 0 : i32
    %c0_i32_1 = arith.constant 0 : i32
    return %c0_i32, %c0_i32_0 : i32, i32
  }
  func.func @transform_5(%arg0: i32) -> (i32, i32) {
    %c0_i32 = arith.constant 0 : i32
    %c0_i32_0 = arith.constant 0 : i32
    %c0_i32_1 = arith.constant 0 : i32
    return %c0_i32, %c0_i32_0 : i32, i32
  }
  func.func @transform_6(%arg0: i32) -> (i32, i32) {
    %c0_i32 = arith.constant 0 : i32
    %c0_i32_0 = arith.constant 0 : i32
    %c0_i32_1 = arith.constant 0 : i32
    return %c0_i32, %c0_i32_0 : i32, i32
  }
  func.func @transform_7(%arg0: i32) -> (i32, i32) {
    %c0_i32 = arith.constant 0 : i32
    %c0_i32_0 = arith.constant 0 : i32
    return %arg0, %c0_i32 : i32, i32
  }
}

</mosaic_0001>

<bundles_post_ra>
// kernel: tpu_custom_call.1
= control target key start
LH: loop header
LB: loop body
LE: loop exit
PB: predicated region body
PF: predicated region fallthrough
CT: control target
= control target key end

     0   :  { %12 = vsyncpa [#allocation3], 0  ;;  %s1366_s0 = inlined_call_operand.hbm [shape: f32[16,128], index: 0, kind: input, shape index: {}]   ;;  %s1367_s1 = inlined_call_operand.hbm [shape: f32[128,128], index: 1, kind: input, shape index: {}]   ;;  %s1368_s2 = inlined_call_operand.vmem [shape: f32[1,128], index: 2, kind: input, shape index: {}]   ;;  %s1369_s3 = inlined_call_operand.hbm [shape: f32[128,128], index: 3, kind: input, shape index: {}]   ;;  %s1370_s4 = inlined_call_operand.vmem [shape: f32[1,128], index: 4, kind: input, shape index: {}]   ;;  %s1371_s5 = inlined_call_operand.vmem [shape: f32[1,128], index: 5, kind: input, shape index: {}]   ;;  %s1372_s6 = inlined_call_operand.vmem [shape: f32[1,128], index: 6, kind: input, shape index: {}]   ;;  %s1373_s7 = inlined_call_operand.hbm [shape: f32[16,128], index: 7, kind: output, shape index: {}]  }
   0x1   :  { %14 = vsyncpa [#allocation3 + $0x1], 0 }
   0x2   :  { %15 = vsyncpa [#allocation6], 0 }
   0x3   :  { %16 = vsyncpa [#allocation4], 0 }
   0x4   :  { %18 = vsyncpa [#allocation4 + $0x1], 0  ;;  %s1102_s24 = smov 0   ;;  %s1104_s25 = smov 0  }
   0x5   :  { %s1106_s26 = smov 0   ;;  %s1108_s27 = smov 0  }
   0x6 LB: > { %s1123_s28 = sadd.s32 4294967295, %s1051_s27   ;;  %s647_s29 = sadd.s32 4294967294, %s1051_s27   ;;  %s1051_s27 = sphi %s1108_s27, %s1393_s27   ;;  %s1047_s26 = sphi %s1106_s26, %s1392_s26   ;;  %s1043_s25 = sphi %s1104_s25, %s1391_s25   ;;  %s1039_s24 = sphi %s1102_s24, %s1390_s24  }
   0x7   : > { %p44_p0 = scmp.ne.s32.totalorder %s1043_s25, %s1039_s24  ;;  %p1374_p1 = scmp.eq.s32.totalorder %s1123_s28, 0 }
   0x8   : > { %p200_p3 = scmp.eq.s32.totalorder %s647_s29, 1  ;;  %p648_p5 = scmp.ge.s32.totalorder %s1051_s27, 1 }
   0x9   : > { %p1132_p4 = por %p1374_p1, %p44_p0  ;;  %p207_p7 = scmp.lt.s32.totalorder %s1051_s27, 3 }
   0xa   : > { %p1137_p6 = por %p200_p3, %p44_p0  ;;  %s1053_s10 = smov [#allocation5]  }
   0xb   : > { %s1377_s30 = scalar_select %p1132_p4, 1, 0 }
   0xc   : > { %s1378_s8 = scalar_select %p1137_p6, 1, 0 }
   0xd   : > { %p1142_p8 = pnand %p648_p5, %p207_p7  ;;  %s219_s11 = sshll.u32 %s1053_s10, 4  ;;  %s1146_s11 = int_to_ptr.vmem [resolvable:$true] %s219_s11 }
   0xe   : > { %s1054_s13 = smov [#allocation7]   ;;  %s895_s17 = scalar_lea.hbm %s1367_s1, 2048 }
   0xf   : > { %p831_p9 = pneg %p1142_p8  ;;  %s235_s14 = sshll.u32 %s1054_s13, 4  ;;  %s1157_s14 = int_to_ptr.vmem [resolvable:$true] %s235_s14 }
  0x10   : > { %p896_p12 = scmp.ne.s32.totalorder %s1367_s1, %s895_s17  ;;  %p902_p5 = scmp.lt.u32.totalorder %s895_s17, %s1367_s1 }
  0x11   : > { %p1153_p11 = pnand %p831_p9, %p1374_p1 }
  0x13   : > { %p897_p13 = pneg %p1153_p11 }
  0x15   : > { %p898_p0 = pnand %p897_p13, %p896_p12 }
  0x17   : > { %p899_p3 = pneg %p898_p0 }
  0x19   : > { %p904_p7 = pnand %p902_p5, %p899_p3 }
  0x1b   : > { %907 = shalt.err (!%p904_p7)
}
  0x1c   : > { %s908_s22 = scalar_lea.vmem %s1146_s11, 2048  ;;  %p916_p2 = scmp.lt.s32.totalorder %s1146_s11, %s1146_s11 }
  0x1d   : > { %p909_p9 = scmp.ne.s32.totalorder %s1146_s11, %s908_s22  ;;  %p917_p12 = scmp.lt.s32.totalorder %s908_s22, %s908_s22 }
  0x1f   : > { %p911_p10 = pnand %p909_p9, %p897_p13  ;;  %p918_p0 = por %p917_p12, %p916_p2 }
  0x21   : > { %p912_p1 = pneg %p911_p10 }
  0x23   : > { %p919_p6 = pnand %p918_p0, %p912_p1 }
  0x25   : > { %922 = shalt.err (!%p919_p6)
}
  0x26   : > { %s1055_s23 = smov 128   ;;  %s1056_s29 = smov 8  }
  0x27   : > { %834 = dma.hbm_to_vmem [thread:$0]  (!%p1153_p11), %s1367_s1, 2048, %s1146_s11, [#allocation6], %s1055_s23, %s1055_s23, %s1056_s29  }
  0x28   : > { %s923_s17 = scalar_lea.hbm %s1369_s3, 2048 }
  0x29   : > { %p924_p2 = scmp.ne.s32.totalorder %s1369_s3, %s923_s17  ;;  %p930_p10 = scmp.lt.u32.totalorder %s923_s17, %s1369_s3 }
  0x2b   : > { %p926_p1 = pnand %p924_p2, %p897_p13 }
  0x2d   : > { %p927_p6 = pneg %p926_p1 }
  0x2f   : > { %p932_p3 = pnand %p930_p10, %p927_p6 }
  0x31   : > { %935 = shalt.err (!%p932_p3)
}
  0x32   : > { %s936_s11 = scalar_lea.vmem %s1157_s14, 2048  ;;  %p944_p12 = scmp.lt.s32.totalorder %s1157_s14, %s1157_s14 }
  0x33   : > { %p937_p5 = scmp.ne.s32.totalorder %s1157_s14, %s936_s11  ;;  %p945_p0 = scmp.lt.s32.totalorder %s936_s11, %s936_s11 }
  0x35   : > { %p939_p7 = pnand %p937_p5, %p897_p13  ;;  %p946_p2 = por %p945_p0, %p944_p12 }
  0x37   : > { %p940_p9 = pneg %p939_p7 }
  0x39   : > { %p947_p1 = pnand %p946_p2, %p940_p9 }
  0x3b   : > { %950 = shalt.err (!%p947_p1)
}
  0x3c   : > { %837 = dma.hbm_to_vmem [thread:$0]  (!%p1153_p11), %s1369_s3, 2048, %s1157_s14, [#allocation6], %s1055_s23, %s1055_s23, %s1056_s29  }
  0x3d   : > { %s1212_s13 = sadd.s32 1, %s1051_s27   ;;  %s31_s12 = sadd.s32 1, %s1047_s26 }
  0x3e   : > { %s28_s15 = ssub.s32 %s1051_s27, %s1212_s13  ;;  %p38_p13 = scmp.ne.s32.totalorder %s1047_s26, %s1043_s25 }
  0x3f   : > { %p29_p6 = scmp.eq.s32.totalorder %s28_s15, 0  ;;  %p39_p10 = scmp.eq.s32.totalorder %s1051_s27, 0 }
  0x40   : > { %p1381_p3 = scmp.eq.s32.totalorder %s1123_s28, 1  ;;  %p848_p7 = scmp.lt.s32.totalorder %s1051_s27, 2 }
  0x41   : > { %s1228_s17 = scalar_select %p29_p6, %s1047_s26, %s31_s12  }
  0x42   : > { %p1222_p5 = por %p1381_p3, %p38_p13  ;;  %p40_p9 = por %p39_p10, %p38_p13 }
  0x43   : > { %s258_s18 = sand.u32 1, %s1047_s26   ;;  %s653_s14 = sshll.u32 %s1051_s27, 7 }
  0x44   : > { %s1382_s16 = scalar_select %p1222_p5, 1, 0 }
  0x45   : > { %s652_s19 = sshll.u32 %s258_s18, 3  ;;  %s1235_s20 = scalar_lea.hbm %s1366_s0, %s653_s14 }
  0x46   : > { %s262_s21 = scalar_lea.vmem [#allocation2], %s652_s19  ;;  %p1239_p11 = pnand %p848_p7, %p40_p9 }
  0x47   : > { %s269_s11 = sshll.u32 %s262_s21, 4  ;;  %s259_s10 = scalar_lea.sflag [#allocation3], %s258_s18  ;;  %s1237_s11 = int_to_ptr.vmem [resolvable:$true] %s269_s11 }
  0x48   : > { %s951_s12 = scalar_lea.hbm %s1235_s20, 128  ;;  %p953_p0 = pneg %p1239_p11 }
  0x49   : > { %p952_p12 = scmp.ne.s32.totalorder %s1235_s20, %s951_s12  ;;  %s956_s14 = scalar_lea.hbm %s1366_s0, 256 }
  0x4a   : > { %p957_p13 = scmp.lt.u32.totalorder %s1235_s20, %s1366_s0  ;;  %p958_p6 = scmp.lt.u32.totalorder %s956_s14, %s951_s12 }
  0x4b   : > { %p954_p2 = pnand %p953_p0, %p952_p12  ;;  %p960_p3 = scmp.lt.u32.totalorder %s951_s12, %s1235_s20 }
  0x4c   : > { %p959_p10 = por %p958_p6, %p957_p13 }
  0x4d   : > { %p955_p1 = pneg %p954_p2 }
  0x4e   : > { %p961_p7 = por %p960_p3, %p959_p10 }
  0x50   : > { %p962_p9 = pnand %p961_p7, %p955_p1 }
  0x52   : > { %965 = shalt.err (!%p962_p9)
}
  0x53   : > { %s966_s18 = scalar_lea.vmem %s1237_s11, 128  ;;  %s1057_s21 = smov [#allocation2]  }
  0x54   : > { %p967_p12 = scmp.ne.s32.totalorder %s1237_s11, %s966_s18  ;;  %s971_s15 = sshll.u32 %s1057_s21, 4  ;;  %s972_s15 = int_to_ptr.vmem [resolvable:$false] %s971_s15 }
  0x55   : > { %s973_s19 = scalar_lea.vmem %s972_s15, 256  ;;  %p974_p4 = scmp.lt.s32.totalorder %s1237_s11, %s972_s15 }
  0x56   : > { %p969_p2 = pnand %p967_p12, %p953_p0  ;;  %p975_p13 = scmp.lt.s32.totalorder %s973_s19, %s966_s18 }
  0x58   : > { %p970_p5 = pneg %p969_p2  ;;  %p976_p6 = por %p975_p13, %p974_p4 }
  0x5a   : > { %p977_p10 = pnand %p976_p6, %p970_p5 }
  0x5c   : > { %980 = shalt.err (!%p977_p10)
}
  0x5d   : > { %841 = dma.hbm_to_vmem [thread:$0]  (!%p1239_p11), %s1235_s20, 128, %s1237_s11, %s259_s10  }
  0x5e   : > { %278 = sbr.rel (%p1142_p8) target bundleno = 906 (0x38a), region = 48  ;;  %s1271_s12 = sand.u32 (!%p1142_p8), 1, %s1043_s25  }
  0x5f   : > { %s655_s14 = sshll.u32 (!%p1142_p8), %s1271_s12, 3  ;;  %s281_s23 = scalar_lea.sflag (!%p1142_p8), [#allocation3], %s1271_s12 }
  0x60   : > { %s1277_s29 = scalar_lea.vmem (!%p1142_p8), [#allocation2], %s655_s14  ;;  %p1384_p4 = scmp.ne.s32.totalorder (!%p1142_p8), %s1377_s30, 0 }
  0x65   : > { %1026 = dma.done.wait (%p1384_p4), %s281_s23, 128  }
  0x66   : > { %1028 = vsyncadd (%p1384_p4), %s281_s23, 4294967168  ;;  %p1385_p5 = scmp.eq.s32.totalorder %s1123_s28, 0 }
  0x68   : > { %1030 = dma.done.wait (%p1385_p5), [#allocation6], 4096   ;;  %p1386_p8 = pmov %p1385_p5 }
  0x69   : > { %v1058_v0 = vmov 0.0|0.0   ;;  %vm1059_vm0 = vmmov 0   ;;  %v1060_v1 = vmov 0.0   ;;  %v324_v2 = vld [vmem:[#allocation5] sm:$0xff]  ;;  %v325_v3 = vld [vmem:[#allocation5 + $0x8] sm:$0xff]  ;;  %v326_v4 = vld [vmem:[#allocation5 + $0x10] sm:$0xff]  ;;  %v516_v61 = vlaneseq }
  0x6a   : > { %1032 = vsyncadd (%p1386_p8), [#allocation6], 4294963200  ;;  %771 = vmatprep.subr.bf16.mxu0 %v1058_v0  ;;  %733 = vmatprep.mubr.msk.f32.mxu0 %vm1059_vm0, %v1060_v1  ;;  %v772_v5 = vpack.c.bf16 %v325_v3, %v324_v2  ;;  %v327_v6 = vld [vmem:[#allocation5 + $0x18] sm:$0xff]  ;;  %v328_v8 = vld [vmem:[#allocation5 + $0x20] sm:$0xff]  ;;  %s664_s15 = sshll.u32 %s1123_s28, 7  ;;  %s322_s19 = scalar_lea.vmem [#allocation8], %s655_s14 }
  0x6b   : > { %795 = vmatprep.subr.bf16.mxu1 %v1058_v0  ;;  %768 = vmatprep.mubr.msk.f32.mxu1 %vm1059_vm0, %v1060_v1  ;;  %v775_v7 = vpack.c.bf16 %v327_v6, %v326_v4  ;;  %v329_v9 = vld [vmem:[#allocation5 + $0x28] sm:$0xff]  ;;  %v418_v10 = vld [vmem:[#allocation7] sm:$0xff]  ;;  %v420_v12 = vld [vmem:[#allocation7 + $0x10] sm:$0xff]  ;;  %v517_v62 = vand.u32 127, %v516_v61  ;;  %s558_s23 = sshll.u32 %s322_s19, 4  ;;  %s1322_s9 = scalar_lea.hbm %s1373_s7, %s664_s15  ;;  %s1324_s23 = int_to_ptr.vmem [resolvable:$true] %s558_s23 }
  0x6c   : > { %773 = vmatpush3.bf16.msra.mxu0 %v772_v5  ;;  %v419_v11 = vld [vmem:[#allocation7 + $0x8] sm:$0xff]  ;;  %v421_v13 = vld [vmem:[#allocation7 + $0x18] sm:$0xff]  ;;  %v778_v14 = vpack.c.bf16 %v329_v9, %v328_v8  ;;  %v330_v16 = vld [vmem:[#allocation5 + $0x30] sm:$0xff]  ;;  %s545_s20 = scalar_lea.sflag [#allocation4], %s1271_s12  ;;  %s981_s11 = scalar_lea.vmem %s1324_s23, 128 }
  0x6d   : > { %774 = vmatprep.subr.bf16.mxu0 %v1058_v0  ;;  %v796_v15 = vpack.c.bf16 %v419_v11, %v418_v10  ;;  %v331_v17 = vld [vmem:[#allocation5 + $0x38] sm:$0xff]  ;;  %v799_v18 = vpack.c.bf16 %v421_v13, %v420_v12  ;;  %v422_v19 = vld [vmem:[#allocation7 + $0x20] sm:$0xff]  ;;  %v423_v20 = vld [vmem:[#allocation7 + $0x28] sm:$0xff]  ;;  %vm518_vm1 = vcmp.lt.s32.totalorder %v517_v62, 32  ;;  %p982_p11 = scmp.ne.s32.totalorder %s1324_s23, %s981_s11  ;;  %p1387_p0 = scmp.ne.s32.totalorder %s1382_s16, 0 }
  0x6e   : > { %v781_v21 = vpack.c.bf16 %v331_v17, %v330_v16  ;;  %v332_v22 = vld [vmem:[#allocation5 + $0x40] sm:$0xff]  ;;  %v333_v23 = vld [vmem:[#allocation5 + $0x48] sm:$0xff]  ;;  %v802_v24 = vpack.c.bf16 %v423_v20, %v422_v19  ;;  %v424_v25 = vld [vmem:[#allocation7 + $0x30] sm:$0xff]  ;;  %s1061_s28 = smov [#allocation8]  }
  0x6f   : > { %797 = vmatpush3.bf16.msra.mxu1 %v796_v15  ;;  %v425_v26 = vld [vmem:[#allocation7 + $0x38] sm:$0xff]  ;;  %v784_v27 = vpack.c.bf16 %v333_v23, %v332_v22  ;;  %v334_v28 = vld [vmem:[#allocation5 + $0x50] sm:$0xff]  ;;  %v426_v31 = vld [vmem:[#allocation7 + $0x40] sm:$0xff]  ;;  %p983_p1 = pnand %p982_p11, %p1387_p0  ;;  %s985_s14 = sshll.u32 %s1061_s28, 4  ;;  %s986_s14 = int_to_ptr.vmem [resolvable:$false] %s985_s14 }
  0x70   : > { %776 = vmatpush3.bf16.msra.mxu0 %v775_v7  ;;  %798 = vmatprep.subr.bf16.mxu1 %v1058_v0  ;;  %v335_v29 = vld [vmem:[#allocation5 + $0x58] sm:$0xff]  ;;  %v805_v30 = vpack.c.bf16 %v425_v26, %v424_v25  ;;  %v427_v32 = vld [vmem:[#allocation7 + $0x48] sm:$0xff]  ;;  %v336_v34 = vld [vmem:[#allocation5 + $0x60] sm:$0xff]  ;;  %s987_s22 = scalar_lea.vmem %s986_s14, 256  ;;  %p988_p7 = scmp.lt.s32.totalorder %s1324_s23, %s986_s14 }
  0x71   : > { %777 = vmatprep.subr.bf16.mxu0 %v1058_v0  ;;  %v787_v33 = vpack.c.bf16 %v335_v29, %v334_v28  ;;  %v337_v35 = vld [vmem:[#allocation5 + $0x68] sm:$0xff]  ;;  %v808_v36 = vpack.c.bf16 %v427_v32, %v426_v31  ;;  %v338_v38 = vld [vmem:[#allocation5 + $0x70] sm:$0xff]  ;;  %v339_v39 = vld [vmem:[#allocation5 + $0x78] sm:$0xff]  ;;  %p984_p3 = pneg %p983_p1  ;;  %p989_p9 = scmp.lt.s32.totalorder %s987_s22, %s981_s11 }
  0x72   : > { %v790_v37 = vpack.c.bf16 %v337_v35, %v336_v34  ;;  %v793_v40 = vpack.c.bf16 %v339_v39, %v338_v38  ;;  %v323_v41 = vld [vmem:[%s1277_s29] sm:$0xff]  ;;  %v430_v45 = vld [vmem:[#allocation7 + $0x60] sm:$0xff]  ;;  %v431_v46 = vld [vmem:[#allocation7 + $0x68] sm:$0xff] }
  0x73   : > { %800 = vmatpush3.bf16.msra.mxu1 %v799_v18  ;;  %v428_v42 = vld [vmem:[#allocation7 + $0x50] sm:$0xff]  ;;  %v429_v43 = vld [vmem:[#allocation7 + $0x58] sm:$0xff]  ;;  %v814_v47 = vpack.c.bf16 %v431_v46, %v430_v45  ;;  %p990_p12 = por %p989_p9, %p988_p7 }
  0x74   : > { %779 = vmatpush3.bf16.msra.mxu0 %v778_v14  ;;  %801 = vmatprep.subr.bf16.mxu1 %v1058_v0  ;;  %v811_v44 = vpack.c.bf16 %v429_v43, %v428_v42  ;;  %v432_v48 = vld [vmem:[#allocation7 + $0x70] sm:$0xff]  ;;  %v433_v49 = vld [vmem:[#allocation7 + $0x78] sm:$0xff] }
  0x75   : > { %780 = vmatprep.subr.bf16.mxu0 %v1058_v0  ;;  %v817_v50 = vpack.c.bf16 %v433_v49, %v432_v48  ;;  %v659_v51 = vld [vmem:[%s1368_s2] ss:$0 sm:$0xff]  ;;  %p991_p2 = pnand %p990_p12, %p984_p3 }
  0x76   : > { %v660_v56 = vld [vmem:[%s1370_s4] ss:$0 sm:$0xff] }
  0x77   : > { %803 = vmatpush3.bf16.msra.mxu1 %v802_v24  ;;  %v661_v8 = vld [vmem:[%s1371_s5] ss:$0 sm:$0xff] }
  0x78   : > { %782 = vmatpush3.bf16.msra.mxu0 %v781_v21  ;;  %804 = vmatprep.subr.bf16.mxu1 %v1058_v0  ;;  %v662_v10 = vld [vmem:[%s1372_s6] ss:$0 sm:$0xff] }
  0x79   : > { %783 = vmatprep.subr.bf16.mxu0 %v1058_v0 }
  0x7b   : > { %806 = vmatpush3.bf16.msra.mxu1 %v805_v30 }
  0x7c   : > { %785 = vmatpush3.bf16.msra.mxu0 %v784_v27  ;;  %807 = vmatprep.subr.bf16.mxu1 %v1058_v0 }
  0x7d   : > { %786 = vmatprep.subr.bf16.mxu0 %v1058_v0 }
  0x7f   : > { %809 = vmatpush3.bf16.msra.mxu1 %v808_v36 }
  0x80   : > { %788 = vmatpush3.bf16.msra.mxu0 %v787_v33  ;;  %810 = vmatprep.subr.bf16.mxu1 %v1058_v0 }
  0x81   : > { %789 = vmatprep.subr.bf16.mxu0 %v1058_v0 }
  0x83   : > { %812 = vmatpush3.bf16.msra.mxu1 %v811_v44 }
  0x84   : > { %791 = vmatpush3.bf16.msra.mxu0 %v790_v37  ;;  %813 = vmatprep.subr.bf16.mxu1 %v1058_v0 }
  0x85   : > { %792 = vmatprep.subr.bf16.mxu0 %v1058_v0 }
  0x87   : > { %815 = vmatpush3.bf16.msra.mxu1 %v814_v47 }
  0x88   : > { %794 = vmatpush3.bf16.msra.mxu0 %v793_v40  ;;  %816 = vmatprep.subr.bf16.mxu1 %v1058_v0 }
  0x8b   : > { %734 = vmatmul.mubr.f32.vlgmr.msra.gmra.mrb[0].mxu0 %v323_v41  ;;  %818 = vmatpush3.bf16.msra.mxu1 %v817_v50 }
 0x15e   : > { %v413_v52 = vpop.f32.mrb[0].mxu0 }
 0x15f   : > { %v414_v53 = vadd.f32 %v659_v51, %v413_v52  ;;  %v735_v54 = vpop.f32.mrb[1].mxu0 }
 0x161   : > { %891 = vtanh.f32 %v414_v53 }
 0x16b   : > { %v892_v55 = vpop.eup %891 }
 0x16c   : > { %769 = vmatmul.mubr.f32.vlgmr.msra.gmra.mrb[0].mxu1 %v892_v55 }
 0x23f   : > { %v507_v57 = vpop.f32.mrb[0].mxu1 }
 0x240   : > { %v508_v58 = vadd.f32 %v660_v56, %v507_v57  ;;  %v770_v59 = vpop.f32.mrb[1].mxu1 }
 0x242   : > { %v511_v60 = vadd.f32 %v508_v58, %v323_v41 }
 0x244   : > { %512 = vadd.xlane.f32.xlu0 %v511_v60 }
 0x2d1   : > { %v513_v63 = vpop.xlane.xlu0 %512 }
 0x2d2   : > { %v514_v0 = vmul.f32 0.03125, %v513_v63 }
 0x2d4   : > { %v515_v1 = vsub.f32 %v511_v60, %v514_v0 }
 0x2d6   : > { %v519_v2 = vsel %vm518_vm1, %v515_v1, 0.0 }
 0x2d7   : > { %v520_v3 = vmul.f32 %v519_v2, %v519_v2 }
 0x2d9   : > { %521 = vadd.xlane.f32.xlu0 %v520_v3 }
 0x366   : > { %v522_v4 = vpop.xlane.xlu0 %521 }
 0x367   : > { %v523_v5 = vmul.f32 0.03125, %v522_v4 }
 0x369   : > { %v524_v6 = vadd.f32 1e-12, %v523_v5 }
 0x36b   : > { %893 = vrsqrt.f32 %v524_v6 }
 0x375   : > { %v894_v7 = vpop.eup %893 }
 0x376   : > { %v526_v9 = vmul.f32 %v894_v7, %v519_v2 }
 0x378   : > { %v534_v11 = vmul.f32 %v661_v8, %v526_v9 }
 0x37a   : > { %v542_v12 = vadd.f32 %v662_v10, %v534_v11 }
 0x37c   : > { %543 = vst [vmem:[%s322_s19] sm:$0xff] %v542_v12 }
 0x37d   : > { %994 = shalt.err (!%p991_p2)
}
 0x37e   : > { %s995_s12 = scalar_lea.hbm %s1322_s9, 128  ;;  %s999_s21 = scalar_lea.hbm %s1373_s7, 256 }
 0x37f   : > { %p996_p13 = scmp.ne.s32.totalorder %s1322_s9, %s995_s12  ;;  %p1000_p4 = scmp.lt.u32.totalorder %s1322_s9, %s1373_s7 }
 0x380   : > { %p1001_p5 = scmp.lt.u32.totalorder %s999_s21, %s995_s12  ;;  %p1003_p11 = scmp.lt.u32.totalorder %s995_s12, %s1322_s9 }
 0x381   : > { %p997_p6 = pnand %p996_p13, %p1387_p0 }
 0x382   : > { %p1002_p8 = por %p1001_p5, %p1000_p4 }
 0x383   : > { %p998_p10 = pneg %p997_p6 }
 0x384   : > { %p1004_p1 = por %p1003_p11, %p1002_p8 }
 0x386   : > { %p1005_p3 = pnand %p1004_p1, %p998_p10 }
 0x388   : > { %1008 = shalt.err (!%p1005_p3)
}
 0x389   : > { %829 = dma.vmem_to_hbm [thread:$0]  (%p1387_p0), %s1324_s23, 128, %s1322_s9, %s545_s20  }
 0x38a PF: > { %s570_s29 = sand.u32 1, %s1039_s24   ;;  %p1388_p7 = scmp.ne.s32.totalorder %s1378_s8, 0 }
 0x38b   : > { %p1389_p9 = scmp.ge.s32.totalorder %s1051_s27, 2  ;;  %s571_s30 = scalar_lea.sflag [#allocation4], %s570_s29 }
 0x38d   : > { %p843_p12 = pnand %p1389_p9, %p1388_p7 }
 0x38f   : > { %1034 = dma.done.wait (!%p843_p12), %s571_s30, 128  }
 0x390   : > { %1036 = vsyncadd (!%p843_p12), %s571_s30, 4294967168  ;;  %p21_p2 = scmp.ge.s32.totalorder %s1212_s13, 4   ;;  %s1390_s24 = smov %s1043_s25 }
 0x391   : > { %s1391_s25 = smov %s1047_s26  ;;  %s1392_s26 = smov %s1228_s17 }
 0x392   : > { %s1393_s27 = smov %s1212_s13  ;;  %23 = sbr.rel (!%p21_p2) target bundleno = 6 (0x6), region = 101 }
 0x399   :  { %576 = vsyncpa [#allocation3], 1 }
 0x39a   :  { %578 = vsyncpa [#allocation3 + $0x1], 1 }
 0x39b   :  { %579 = vsyncpa [#allocation6], 1 }
 0x39c   :  { %580 = vsyncpa [#allocation4], 1 }
 0x39d   :  { %582 = vsyncpa [#allocation4 + $0x1], 1 }

</bundles_post_ra>
